<compile_context>
chip_gen: v7x
topology: tpu7x:2x2x1
jax: 0.10.0
libtpu: 0.0.40
codegen_flags: <defaults>
</compile_context>

<pallas_src>
import functools

import jax
import jax.numpy as jnp
from jax.experimental import pallas as pl
from jax.experimental.pallas import tpu as pltpu


_EPS = 1e-5
_VMEM_LIMIT_BYTES = 48 * 1024 * 1024     # explicit scoped-VMEM budget (v5e/v6e/v7x safe)
_TILE_BUDGET_BYTES = 24 * 1024 * 1024    # double-buffered per-step block budget


def _round_up(x, m):
    return (x + m - 1) // m * m


# ---------------------------------------------------------------------------
# Pallas kernels: one big-K bf16 matmul per tile, f32 epilogue, bf16 store.
# ---------------------------------------------------------------------------
def _conv_bn_kernel(x_ref, w_ref, bias_ref, o_ref, *, relu):
    acc = jnp.dot(x_ref[...], w_ref[...], preferred_element_type=jnp.float32)
    y = acc + bias_ref[...]
    if relu:
        y = jnp.maximum(y, 0.0)
    o_ref[...] = y.astype(o_ref.dtype)


def _conv_bn_add_relu_kernel(x_ref, w_ref, bias_ref, res_ref, o_ref):
    acc = jnp.dot(x_ref[...], w_ref[...], preferred_element_type=jnp.float32)
    y = acc + bias_ref[...] + res_ref[...].astype(jnp.float32)
    o_ref[...] = jnp.maximum(y, 0.0).astype(o_ref.dtype)


# ---------------------------------------------------------------------------
# Glue: merged-K im2col and tile-size selection
# ---------------------------------------------------------------------------
def _im2col(x_nhwc, ksize, stride, padding):
    """(N,H,W,C) -> (N*Ho*Wo, K*K*C); taps merged into the contraction axis."""
    n, h, w, c = x_nhwc.shape
    ho = (h + 2 * padding - ksize) // stride + 1
    wo = (w + 2 * padding - ksize) // stride + 1
    xp = x_nhwc
    if padding:
        xp = jnp.pad(x_nhwc, ((0, 0), (padding, padding), (padding, padding), (0, 0)))
    cols = []
    for kh in range(ksize):
        for kw in range(ksize):
            sl = xp[:, kh:kh + (ho - 1) * stride + 1:stride,
                       kw:kw + (wo - 1) * stride + 1:stride, :]
            cols.append(sl.reshape(n * ho * wo, c))
    out = cols[0] if len(cols) == 1 else jnp.concatenate(cols, axis=-1)
    return out, ho, wo


def _pick_tile_m(m, kdim, tn, has_residual):
    """Largest row tile (<=512) whose double-buffered bf16 blocks fit the budget."""
    m8 = _round_up(max(m, 8), 8)
    best = 8
    for tm in (8, 16, 32, 64, 128, 256, 512):
        if tm > m8:
            break
        per_step = (2 * 2 * tm * kdim                                # taps block
                    + 2 * 2 * kdim * tn                              # weight block
                    + 2 * 2 * tm * tn * (2 if has_residual else 1)   # out (+res)
                    + 2 * 4 * tn)                                    # f32 bias row
        if per_step <= _TILE_BUDGET_BYTES:
            best = tm
    # Keep >=2 steps on the M grid axis when possible so both v7x TensorCores
    # (and the megacore scheduler generally) get work.
    while best > 8 and -(-m // best) < 2:
        best //= 2
    return best


# ---------------------------------------------------------------------------
# Wrapper: conv (KxK, stride, pad) + folded BN (+relu / +residual+relu)
# ---------------------------------------------------------------------------
def conv_bn_pallas(x_nhwc, w_kkio, scale, bias, *, stride=1, padding=1,
                   relu=False, residual=None):
    """x_nhwc: (N,H,W,Cin); w_kkio: (K,K,Cin,Cout) f32; scale/bias: (Cout,).

    residual (optional): (N*Ho*Wo, Cout). Returns (N,Ho,Wo,Cout) bf16.
    """
    n = x_nhwc.shape[0]
    cin = x_nhwc.shape[-1]
    k = w_kkio.shape[0]
    cout = w_kkio.shape[-1]
    kdim = k * k * cin

    # bf16 im2col with the taps merged into the contraction dimension.
    cols, ho, wo = _im2col(x_nhwc.astype(jnp.bfloat16), k, stride, padding)
    m = n * ho * wo

    # Fold BN scale into the weights (in f32), then cast to bf16.
    w = w_kkio.astype(jnp.float32) * scale.astype(jnp.float32)[None, None, None, :]
    w = w.reshape(kdim, cout)
    bias_f = bias.astype(jnp.float32).reshape(1, cout)

    # Lane-dense output: pad Cout to a multiple of 128; pad M to the row tile.
    cout_p = _round_up(cout, 128)
    tn = 256 if cout_p % 256 == 0 else 128
    tm = _pick_tile_m(m, kdim, tn, residual is not None)
    m_p = _round_up(m, tm)

    cols_p = jnp.pad(cols, ((0, m_p - m), (0, 0))) if m_p != m else cols
    w_p = jnp.pad(w, ((0, 0), (0, cout_p - cout))).astype(jnp.bfloat16)
    bias_p = jnp.pad(bias_f, ((0, 0), (0, cout_p - cout)))

    in_specs = [
        pl.BlockSpec((tm, kdim), lambda i, j: (i, 0)),   # activations tile
        pl.BlockSpec((kdim, tn), lambda i, j: (0, j)),   # (scaled) weights tile
        pl.BlockSpec((1, tn), lambda i, j: (0, j)),      # f32 bias row
    ]
    args = [cols_p, w_p, bias_p]
    bytes_accessed = 2 * m_p * kdim + 2 * kdim * cout_p + 2 * m_p * cout_p + 4 * cout_p

    if residual is not None:
        res_p = jnp.pad(residual.astype(jnp.bfloat16),
                        ((0, m_p - m), (0, cout_p - cout)))
        in_specs.append(pl.BlockSpec((tm, tn), lambda i, j: (i, j)))
        args.append(res_p)
        bytes_accessed += 2 * m_p * cout_p
        kernel = _conv_bn_add_relu_kernel
    else:
        kernel = functools.partial(_conv_bn_kernel, relu=relu)

    out = pl.pallas_call(
        kernel,
        out_shape=jax.ShapeDtypeStruct((m_p, cout_p), jnp.bfloat16),
        grid_spec=pltpu.PrefetchScalarGridSpec(
            num_scalar_prefetch=0,
            grid=(m_p // tm, cout_p // tn),
            in_specs=in_specs,
            out_specs=pl.BlockSpec((tm, tn), lambda i, j: (i, j)),
        ),
        compiler_params=pltpu.CompilerParams(
            dimension_semantics=("parallel", "parallel"),
            vmem_limit_bytes=_VMEM_LIMIT_BYTES),
        cost_estimate=pl.CostEstimate(
            flops=2 * m_p * kdim * cout_p,
            transcendentals=0,
            bytes_accessed=int(bytes_accessed)),
    )(*args)

    # Crop padded tail rows / channels and restore the spatial shape.
    return out[:m, :cout].reshape(n, ho, wo, cout)


# ---------------------------------------------------------------------------
# BasicBlock parameters + forward
# ---------------------------------------------------------------------------
def _init_bn(key, c):
    k1, k2, k3, k4 = jax.random.split(key, 4)
    return dict(
        gamma=1.0 + 0.1 * jax.random.normal(k1, (c,), jnp.float32),
        beta=0.1 * jax.random.normal(k2, (c,), jnp.float32),
        mean=0.05 * jax.random.normal(k3, (c,), jnp.float32),
        var=1.0 + 0.1 * jax.random.uniform(k4, (c,), jnp.float32),
    )


def _fold_bn(bn):
    scale = bn["gamma"] / jnp.sqrt(bn["var"] + _EPS)
    bias = bn["beta"] - bn["mean"] * scale
    return scale, bias


def init_basic_block_params(key, in_channels, out_channels, stride):
    ks = jax.random.split(key, 8)
    params = {
        # PyTorch conv weight layout: (Cout, Cin, kH, kW)
        "w1": 0.1 * jax.random.normal(ks[0], (out_channels, in_channels, 3, 3), jnp.float32),
        "bn1": _init_bn(ks[1], out_channels),
        "w2": 0.1 * jax.random.normal(ks[2], (out_channels, out_channels, 3, 3), jnp.float32),
        "bn2": _init_bn(ks[3], out_channels),
    }
    if stride != 1 or in_channels != out_channels:
        params["ws"] = 0.1 * jax.random.normal(
            ks[4], (out_channels, in_channels, 1, 1), jnp.float32)
        params["bns"] = _init_bn(ks[5], out_channels)
    return params


def basic_block_forward(x_nchw, params, *, stride=1):
    """Pallas implementation of BasicBlock.forward. Input/output are NCHW f32."""
    x = jnp.transpose(x_nchw, (0, 2, 3, 1))          # NCHW -> NHWC
    s1, b1 = _fold_bn(params["bn1"])
    s2, b2 = _fold_bn(params["bn2"])
    w1 = jnp.transpose(params["w1"], (2, 3, 1, 0))   # (kh, kw, Cin, Cout)
    w2 = jnp.transpose(params["w2"], (2, 3, 1, 0))
    cout = params["w1"].shape[0]

    out1 = conv_bn_pallas(x, w1, s1, b1, stride=stride, padding=1, relu=True)

    if "ws" in params:
        ss, bs = _fold_bn(params["bns"])
        ws = jnp.transpose(params["ws"], (2, 3, 1, 0))
        shortcut = conv_bn_pallas(x, ws, ss, bs, stride=stride, padding=0, relu=False)
    else:
        shortcut = x.astype(jnp.bfloat16)

    residual = shortcut.reshape(-1, cout)            # native bf16, no f32 upcast
    out2 = conv_bn_pallas(out1, w2, s2, b2, stride=1, padding=1, residual=residual)
    return jnp.transpose(out2, (0, 3, 1, 2)).astype(jnp.float32)   # NHWC -> NCHW


# ---------------------------------------------------------------------------
# Pure-JAX f32 reference (for correctness check)
# ---------------------------------------------------------------------------
def _conv_ref(x, w, stride, padding):
    return jax.lax.conv_general_dilated(
        x, w, (stride, stride), [(padding, padding)] * 2,
        dimension_numbers=("NCHW", "OIHW", "NCHW"))


def _bn_ref(x, bn):
    s, b = _fold_bn(bn)
    return x * s[None, :, None, None] + b[None, :, None, None]


def basic_block_reference(x, params, *, stride=1):
    y = _conv_ref(x, params["w1"], stride, 1)
    y = jnp.maximum(_bn_ref(y, params["bn1"]), 0.0)
    y = _conv_ref(y, params["w2"], 1, 1)
    y = _bn_ref(y, params["bn2"])
    if "ws" in params:
        sc = _conv_ref(x, params["ws"], stride, 0)
        sc = _bn_ref(sc, params["bns"])
    else:
        sc = x
    return jnp.maximum(y + sc, 0.0)


# ---------------------------------------------------------------------------
if __name__ == "__main__":
    key = jax.random.PRNGKey(0)

    configs = [
        # (N, C_in, H, W, C_out, stride)
        (2, 4, 16, 16, 8, 1),    # projection shortcut (channel change)
        (2, 8, 16, 16, 8, 2),    # projection shortcut (stride 2)
        (2, 8, 16, 16, 8, 1),    # identity shortcut
    ]
    for idx, (n, cin, h, w, cout, stride) in enumerate(configs):
        kx, kp = jax.random.split(jax.random.fold_in(key, idx))
        x = jax.random.normal(kx, (n, cin, h, w), jnp.float32)
        params = init_basic_block_params(kp, cin, cout, stride)

        y = jax.block_until_ready(basic_block_forward(x, params, stride=stride))
        y_ref = basic_block_reference(x, params, stride=stride)

        assert y.shape == (n, cout, h // stride, w // stride), y.shape
        assert bool(jnp.all(jnp.isfinite(y)))
        max_err = float(jnp.max(jnp.abs(y - y_ref)))
        # bf16 activations/weights vs f32 reference -> loosened tolerance.
        assert bool(jnp.allclose(y, y_ref, atol=5e-2, rtol=5e-2)), (idx, max_err)

    print("KERNEL_OK")
</pallas_src>

<mosaic_0001>
module attributes {stable_mosaic.version = 11 : i64} {
  func.func @_conv_bn_kernel(%arg0: i32, %arg1: i32, %arg2: memref<256x36xbf16, #tpu.memory_space<vmem>>, %arg3: memref<36x128xbf16, #tpu.memory_space<vmem>>, %arg4: memref<1x128xf32, #tpu.memory_space<vmem>>, %arg5: memref<256x128xbf16, #tpu.memory_space<vmem>>) attributes {dimension_semantics = [#tpu.dimension_semantics<parallel>, #tpu.dimension_semantics<parallel>], iteration_bounds = array<i64: 2, 1>, scalar_prefetch = 0 : i64, scratch_operands = 0 : i64, tpu.core_type = #tpu.core_type<tc>, window_params = [{transform_indices = @transform_0, window_bounds = array<i64: 256, 36>}, {transform_indices = @transform_1, window_bounds = array<i64: 36, 128>}, {transform_indices = @transform_2, window_bounds = array<i64: 1, 128>}, {transform_indices = @transform_3, window_bounds = array<i64: 256, 128>}]} {
    %c0 = arith.constant 0 : index
    %c0_0 = arith.constant 0 : index
    %0 = vector.load %arg2[%c0, %c0_0] : memref<256x36xbf16, #tpu.memory_space<vmem>>, vector<256x36xbf16>
    %c0_1 = arith.constant 0 : index
    %c0_2 = arith.constant 0 : index
    %1 = vector.load %arg3[%c0_1, %c0_2] : memref<36x128xbf16, #tpu.memory_space<vmem>>, vector<36x128xbf16>
    %cst = arith.constant dense<0.000000e+00> : vector<256x128xf32>
    %2 = tpu.matmul %0, %1, %cst {dimension_numbers = #tpu.dot_dimension_numbers<[1], [0], [0], [1], [0, 0, 1, 1], [], []>} : vector<256x36xbf16>, vector<36x128xbf16>, vector<256x128xf32> -> vector<256x128xf32>
    %c0_3 = arith.constant 0 : index
    %c0_4 = arith.constant 0 : index
    %3 = vector.load %arg4[%c0_3, %c0_4] : memref<1x128xf32, #tpu.memory_space<vmem>>, vector<1x128xf32>
    %4 = vector.broadcast %3 : vector<1x128xf32> to vector<256x128xf32>
    %5 = arith.addf %2, %4 : vector<256x128xf32>
    %cst_5 = arith.constant 0.000000e+00 : f32
    %6 = vector.broadcast %cst_5 : f32 to vector<256x128xf32>
    %7 = arith.maximumf %5, %6 : vector<256x128xf32>
    %8 = arith.truncf %7 : vector<256x128xf32> to vector<256x128xbf16>
    %c0_6 = arith.constant 0 : index
    %c0_7 = arith.constant 0 : index
    %9 = vector.load %arg5[%c0_6, %c0_7] : memref<256x128xbf16, #tpu.memory_space<vmem>>, vector<256x128xbf16>
    tpu.vector_store %arg5[%c0_6, %c0_7], %8 {strides = array<i32>} : memref<256x128xbf16, #tpu.memory_space<vmem>>, vector<256x128xbf16>,
    return
  }
  func.func @transform_0(%arg0: i32, %arg1: i32) -> (i32, i32) {
    %c0_i32 = arith.constant 0 : i32
    %c0_i32_0 = arith.constant 0 : i32
    return %arg0, %c0_i32 : i32, i32
  }
  func.func @transform_1(%arg0: i32, %arg1: i32) -> (i32, i32) {
    %c0_i32 = arith.constant 0 : i32
    %c0_i32_0 = arith.constant 0 : i32
    return %c0_i32, %arg1 : i32, i32
  }
  func.func @transform_2(%arg0: i32, %arg1: i32) -> (i32, i32) {
    %c0_i32 = arith.constant 0 : i32
    %c0_i32_0 = arith.constant 0 : i32
    return %c0_i32, %arg1 : i32, i32
  }
  func.func @transform_3(%arg0: i32, %arg1: i32) -> (i32, i32) {
    %c0_i32 = arith.constant 0 : i32
    return %arg0, %arg1 : i32, i32
  }
}

</mosaic_0001>

<bundles_post_ra>
// kernel: tpu_custom_call.1
= control target key start
LH: loop header
LB: loop body
LE: loop exit
PB: predicated region body
PF: predicated region fallthrough
CT: control target
= control target key end

     0   :  { %8 = vsyncpa [#allocation3], 0  ;;  %s1549_s0 = inlined_call_operand.vmem [shape: bf16[512,36], index: 0, kind: input, shape index: {}]   ;;  %s1550_s1 = inlined_call_operand.vmem [shape: bf16[36,128], index: 1, kind: input, shape index: {}]   ;;  %s1551_s2 = inlined_call_operand.vmem [shape: f32[1,128], index: 2, kind: input, shape index: {}]   ;;  %s1552_s3 = inlined_call_operand.hbm [shape: bf16[512,128], index: 3, kind: output, shape index: {}]  }
   0x1   :  { %10 = vsyncpa [#allocation3 + $0x1], 0  ;;  %s1332_s12 = smov 0   ;;  %s1334_s13 = smov 0  }
   0x2   :  { %s1336_s14 = smov 0   ;;  %s1338_s15 = smov 0  }
   0x3   :  { %s1340_s16 = smov 0   ;;  %s1342_s17 = smov 0  }
   0x4 LB: > { %s877_s18 = sadd.s32 4294967295, %s1307_s17   ;;  %s878_s19 = sadd.s32 4294967294, %s1307_s17   ;;  %s1307_s17 = sphi %s1342_s17, %s16_s17   ;;  %s1303_s16 = sphi %s1340_s16, %s1559_s16   ;;  %s1299_s15 = sphi %s1338_s15, %s1558_s15   ;;  %s1295_s14 = sphi %s1336_s14, %s1557_s14   ;;  %s1291_s13 = sphi %s1334_s13, %s1556_s13   ;;  %s1287_s12 = sphi %s1332_s12, %s1555_s12  }
   0x5   : > { %s28_s20 = sadd.s32 1, %s1303_s16  ;;  %s115_s21 = sadd.s32 1, %s1295_s14 }
   0x6   : > { %p30_p0 = scmp.ge.s32.totalorder %s28_s20, 2  ;;  %p125_p1 = scmp.ne.s32.totalorder %s1295_s14, %s1291_s13 }
   0x7   : > { %p126_p2 = scmp.eq.s32.totalorder %s877_s18, 1  ;;  %p131_p3 = scmp.ne.s32.totalorder %s1291_s13, %s1287_s12 }
   0x8   : > { %s1561_s20 = smov (%p30_p0, %s28_s20), 0  ;;  %p132_p5 = scmp.eq.s32.totalorder %s878_s19, 1 }
   0x9   : > { %p1372_p4 = por %p126_p2, %p125_p1  ;;  %s110_s23 = ssub.s32 %s1303_s16, %s1561_s20 }
   0xa   : > { %p883_p6 = scmp.ge.s32.totalorder %s1307_s17, 1  ;;  %p113_p7 = scmp.eq.s32.totalorder %s110_s23, 0 }
   0xb   : > { %p1379_p8 = por %p132_p5, %p131_p3  ;;  %p172_p9 = scmp.lt.s32.totalorder %s1307_s17, 3 }
   0xc   : > { %s1385_s25 = scalar_select %p113_p7, %s1295_s14, %s115_s21  }
   0xd   : > { %p173_p10 = pnand %p883_p6, %p172_p9 }
   0xe   : > { %v1210_v0 = vld [vmem:[%s1550_s1] sm:$0xff] (!%p173_p10)   ;;  %v1211_v1 = vld [vmem:[%s1550_s1 + $0x8] sm:$0xff] (!%p173_p10)   ;;  %s885_s30 = sshll.u32 (!%p173_p10), %s1299_s15, 5  ;;  %v1212_v2 = vld [vmem:[%s1550_s1 + $0x10] ss:$0 sps:$4 sm:$0x33] (!%p173_p10)  }
   0xf   : > { %176 = sbr.rel (%p173_p10) target bundleno = 288 (0x120), region = 32  ;;  %1107 = vmatprep.subr.bf16.mxu0 (!%p173_p10), %v1210_v0  ;;  %1145 = vmatprep.subr.bf16.mxu1 (!%p173_p10), %v1210_v0  ;;  %p204_p11 = scmp.lt.s32.totalorder (!%p173_p10), %s885_s30, 63  ;;  %vm406_vm0 = vcmask (!%p173_p10), 1041408   ;;  %vm357_vm1 = vcmask (!%p173_p10), 293888   ;;  %v1437_v20 = vld [vmem:[%s1551_s2] ss:$0 sm:$0xff] (!%p173_p10) }
  0x10   : > { %1108 = vmatpush3.bf16.msra.mxu0 (!%p173_p10), %v1210_v0  ;;  %1148 = vmatpush3.bf16.msra.mxu1 (!%p173_p10), %v1210_v0  ;;  %v408_v3 = vsel (!%p173_p10), %vm406_vm0, %v1212_v2, 0  ;;  %s200_s18 = sand.u32 (!%p173_p10), 1, %s1291_s13   ;;  %s992_s23 = sshll.u32 (!%p173_p10), %s1299_s15, 11 }
  0x11   : > { %1109 = vmatprep.subr.bf16.mxu0 (!%p173_p10), %v1211_v1  ;;  %1146 = vmatprep.subr.bf16.mxu1 (!%p173_p10), %v1211_v1  ;;  %s884_s19 = sshll.u32 (!%p173_p10), %s200_s18, 7  ;;  %s1493_s15 = scalar_lea.hbm (!%p173_p10), %s1552_s3, %s992_s23 }
  0x12   : > { %s1450_s21 = scalar_lea.vmem (!%p173_p10), [#allocation2], %s884_s19  ;;  %s1503_s29 = scalar_lea.sflag (!%p173_p10), [#allocation3], %s200_s18 }
  0x13   : > { %s778_s26 = sshll.u32 (!%p173_p10), %s1450_s21, 4  ;;  %s1309_s4 = smov (!%p173_p10), [#allocation2]   ;;  %s1495_s26 = int_to_ptr.vmem [resolvable:$true] %s778_s26 }
  0x14   : > { %1110 = vmatpush3.bf16.msra.mxu0 (!%p173_p10), %v1211_v1  ;;  %1149 = vmatpush3.bf16.msra.mxu1 (!%p173_p10), %v1211_v1  ;;  %s1233_s5 = sshll.u32 (!%p173_p10), %s1309_s4, 4  ;;  %s1234_s5 = int_to_ptr.vmem [resolvable:$false] %s1233_s5 }
  0x15   : > { %1151 = vmatprep.subr.msk.bf16.mxu0 (!%p173_p10), %vm406_vm0, %v1212_v2  ;;  %1152 = vmatprep.subr.msk.bf16.mxu1 (!%p173_p10), %vm406_vm0, %v1212_v2  ;;  %p1236_p1 = scmp.lt.s32.totalorder (!%p173_p10), %s1495_s26, %s1234_s5 }
  0x16   : > { %s1563_s30 = smov (!%p204_p11, %s885_s30), 63 }
  0x17   : > { %s886_s6 = sshll.u32 %s1563_s30, 2  ;;  %s1229_s30 = scalar_lea.vmem %s1495_s26, 2048 }
  0x18   : > { %s1400_s9 = scalar_lea.vmem %s1549_s0, %s886_s6  ;;  %1112 = vmatpush3.bf16.msra.mxu0 %v408_v3  ;;  %1150 = vmatpush3.bf16.msra.mxu1 %v408_v3  ;;  %p1230_p12 = scmp.ne.s32.totalorder %s1495_s26, %s1229_s30 }
  0x19   : > { %v1213_v4 = vld [vmem:[%s1400_s9] sm:$0xff]   ;;  %v1215_v6 = vld [vmem:[%s1400_s9 + $0x8] sm:$0xff]   ;;  %v1217_v8 = vld [vmem:[%s1400_s9 + $0x10] sm:$0xff]   ;;  %s1235_s6 = scalar_lea.vmem %s1234_s5, 4096 }
  0x1a   : > { %v1214_v5 = vld [vmem:[%s1400_s9 + $0x40] sm:$0xff]   ;;  %1113 = vmatprep.mubr.msk.bf16.mxu0 %vm357_vm1, %v1213_v4  ;;  %v1216_v7 = vld [vmem:[%s1400_s9 + $0x48] sm:$0xff]   ;;  %v1218_v9 = vld [vmem:[%s1400_s9 + $0x50] sm:$0xff]   ;;  %p1231_p13 = pnand %p1230_p12, %p1372_p4  ;;  %p1237_p2 = scmp.lt.s32.totalorder %s1235_s6, %s1229_s30 }
  0x1b   : > { %1129 = vmatprep.mubr.msk.bf16.mxu1 %vm357_vm1, %v1214_v5  ;;  %1114 = vmatmul.mubr.msk.bf16.vlgmr.msra.gmra.mrb[0].mxu0 %vm357_vm1, %v1215_v6  ;;  %v1219_v10 = vld [vmem:[%s1400_s9 + $0x18] sm:$0xff]   ;;  %v1221_v12 = vld [vmem:[%s1400_s9 + $0x20] sm:$0xff]   ;;  %v1223_v14 = vld [vmem:[%s1400_s9 + $0x28] sm:$0xff]  }
  0x1c   : > { %1130 = vmatmul.mubr.msk.bf16.vlgmr.msra.gmra.mrb[0].mxu1 %vm357_vm1, %v1216_v7  ;;  %1117 = vmatprep.mubr.msk.bf16.mxu0 %vm357_vm1, %v1217_v8  ;;  %v1220_v11 = vld [vmem:[%s1400_s9 + $0x58] sm:$0xff]   ;;  %v1222_v13 = vld [vmem:[%s1400_s9 + $0x60] sm:$0xff]   ;;  %v1224_v15 = vld [vmem:[%s1400_s9 + $0x68] sm:$0xff]   ;;  %p1232_p0 = pneg %p1231_p13  ;;  %p1238_p3 = por %p1237_p2, %p1236_p1 }
  0x1d   : > { %1133 = vmatprep.mubr.msk.bf16.mxu1 %vm357_vm1, %v1218_v9  ;;  %v1225_v16 = vld [vmem:[%s1400_s9 + $0x30] sm:$0xff]   ;;  %v1227_v18 = vld [vmem:[%s1400_s9 + $0x38] sm:$0xff]  }
  0x1e   : > { %v1226_v17 = vld [vmem:[%s1400_s9 + $0x70] sm:$0xff]   ;;  %v1228_v19 = vld [vmem:[%s1400_s9 + $0x78] sm:$0xff]   ;;  %p1239_p5 = pnand %p1238_p3, %p1232_p0 }
  0x23   : > { %1118 = vmatmul.mubr.msk.bf16.gmra.mrb[4].mxu0 %vm357_vm1, %v1219_v10 }
  0x24   : > { %1134 = vmatmul.mubr.msk.bf16.gmra.mrb[4].mxu1 %vm357_vm1, %v1220_v11  ;;  %1121 = vmatprep.mubr.msk.bf16.mxu0 %vm357_vm1, %v1221_v12 }
  0x25   : > { %1137 = vmatprep.mubr.msk.bf16.mxu1 %vm357_vm1, %v1222_v13 }
  0x2b   : > { %1122 = vmatmul.mubr.msk.bf16.gmra.mrb[8].mxu0 %vm357_vm1, %v1223_v14 }
  0x2c   : > { %1138 = vmatmul.mubr.msk.bf16.gmra.mrb[8].mxu1 %vm357_vm1, %v1224_v15  ;;  %1125 = vmatprep.mubr.msk.bf16.mxu0 %vm357_vm1, %v1225_v16 }
  0x2d   : > { %1141 = vmatprep.mubr.msk.bf16.mxu1 %vm357_vm1, %v1226_v17 }
  0x33   : > { %1126 = vmatmul.mubr.msk.bf16.gmra.mrb[12].mxu0 %vm357_vm1, %v1227_v18 }
  0x34   : > { %1142 = vmatmul.mubr.msk.bf16.gmra.mrb[12].mxu1 %vm357_vm1, %v1228_v19 }
  0xee   : > { %v1115_v21 = vpop.f32.mrb[0].mxu0 }
  0xef   : > { %v1131_v22 = vpop.f32.mrb[0].mxu1  ;;  %v453_v23 = vadd.f32 %v1115_v21, %v1437_v20  ;;  %v444_v25 = vpop.f32.mrb[1].mxu0 }
  0xf0   : > { %v517_v24 = vadd.f32 %v1131_v22, %v1437_v20  ;;  %v508_v26 = vpop.f32.mrb[1].mxu1  ;;  %v445_v27 = vadd.f32 %v1437_v20, %v444_v25  ;;  %v1116_v29 = vpop.f32.mrb[2].mxu0 }
  0xf1   : > { %v509_v28 = vadd.f32 %v1437_v20, %v508_v26  ;;  %v1132_v30 = vpop.f32.mrb[2].mxu1  ;;  %v456_v31 = vadd.f32 %v1116_v29, %v1437_v20  ;;  %v447_v33 = vpop.f32.mrb[3].mxu0  ;;  %v573_v37 = vmax.f32 %v453_v23, 0.0 }
  0xf2   : > { %v520_v32 = vadd.f32 %v1132_v30, %v1437_v20  ;;  %v511_v34 = vpop.f32.mrb[3].mxu1  ;;  %v448_v35 = vadd.f32 %v1437_v20, %v447_v33  ;;  %v589_v38 = vmax.f32 %v517_v24, 0.0  ;;  %v571_v41 = vmax.f32 %v445_v27, 0.0 }
  0xf3   : > { %v512_v36 = vadd.f32 %v1437_v20, %v511_v34  ;;  %v574_v39 = vmax.f32 %v456_v31, 0.0  ;;  %v587_v42 = vmax.f32 %v509_v28, 0.0 }
  0xf4   : > { %v590_v40 = vmax.f32 %v520_v32, 0.0  ;;  %v572_v43 = vmax.f32 %v448_v35, 0.0 }
  0xf5   : > { %v588_v44 = vmax.f32 %v512_v36, 0.0  ;;  %v1001_v45 = vpack.c.bf16 %v574_v39, %v573_v37 }
  0xf6   : > { %v1041_v46 = vpack.c.bf16 %v590_v40, %v589_v38  ;;  %v996_v47 = vpack.c.bf16 %v572_v43, %v571_v41  ;;  %v1119_v49 = vpop.f32.mrb[4].mxu0 }
  0xf7   : > { %v1036_v48 = vpack.c.bf16 %v588_v44, %v587_v42  ;;  %v1135_v50 = vpop.f32.mrb[4].mxu1  ;;  %1073 = vst [vmem:[%s1450_s21 + $0x8] sm:$0xff] %v1001_v45   ;;  %v469_v51 = vadd.f32 %v1119_v49, %v1437_v20  ;;  %v460_v53 = vpop.f32.mrb[5].mxu0 }
  0xf8   : > { %1081 = vst [vmem:[%s1450_s21 + $0x48] sm:$0xff] %v1041_v46   ;;  %v533_v52 = vadd.f32 %v1135_v50, %v1437_v20  ;;  %v524_v54 = vpop.f32.mrb[5].mxu1  ;;  %997 = vst [vmem:[%s1450_s21] sm:$0xff] %v996_v47   ;;  %v461_v55 = vadd.f32 %v1437_v20, %v460_v53  ;;  %v1120_v57 = vpop.f32.mrb[6].mxu0 }
  0xf9   : > { %1080 = vst [vmem:[%s1450_s21 + $0x40] sm:$0xff] %v1036_v48   ;;  %v525_v56 = vadd.f32 %v1437_v20, %v524_v54  ;;  %v1136_v58 = vpop.f32.mrb[6].mxu1  ;;  %v472_v59 = vadd.f32 %v1120_v57, %v1437_v20  ;;  %v463_v61 = vpop.f32.mrb[7].mxu0  ;;  %v577_v1 = vmax.f32 %v469_v51, 0.0 }
  0xfa   : > { %v536_v60 = vadd.f32 %v1136_v58, %v1437_v20  ;;  %v527_v62 = vpop.f32.mrb[7].mxu1  ;;  %v464_v63 = vadd.f32 %v1437_v20, %v463_v61  ;;  %v593_v2 = vmax.f32 %v533_v52, 0.0  ;;  %v575_v5 = vmax.f32 %v461_v55, 0.0 }
  0xfb   : > { %v528_v0 = vadd.f32 %v1437_v20, %v527_v62  ;;  %v578_v3 = vmax.f32 %v472_v59, 0.0  ;;  %v591_v6 = vmax.f32 %v525_v56, 0.0 }
  0xfc   : > { %v594_v4 = vmax.f32 %v536_v60, 0.0  ;;  %v576_v7 = vmax.f32 %v464_v63, 0.0 }
  0xfd   : > { %v592_v8 = vmax.f32 %v528_v0, 0.0  ;;  %v1011_v9 = vpack.c.bf16 %v578_v3, %v577_v1 }
  0xfe   : > { %v1051_v10 = vpack.c.bf16 %v594_v4, %v593_v2  ;;  %v1006_v11 = vpack.c.bf16 %v576_v7, %v575_v5  ;;  %v1123_v13 = vpop.f32.mrb[8].mxu0 }
  0xff   : > { %v1046_v12 = vpack.c.bf16 %v592_v8, %v591_v6  ;;  %v1139_v14 = vpop.f32.mrb[8].mxu1  ;;  %1075 = vst [vmem:[%s1450_s21 + $0x18] sm:$0xff] %v1011_v9   ;;  %v485_v15 = vadd.f32 %v1123_v13, %v1437_v20  ;;  %v476_v17 = vpop.f32.mrb[9].mxu0 }
 0x100   : > { %1083 = vst [vmem:[%s1450_s21 + $0x58] sm:$0xff] %v1051_v10   ;;  %v549_v16 = vadd.f32 %v1139_v14, %v1437_v20  ;;  %v540_v18 = vpop.f32.mrb[9].mxu1  ;;  %1074 = vst [vmem:[%s1450_s21 + $0x10] sm:$0xff] %v1006_v11   ;;  %v477_v19 = vadd.f32 %v1437_v20, %v476_v17  ;;  %v1124_v22 = vpop.f32.mrb[10].mxu0 }
 0x101   : > { %1082 = vst [vmem:[%s1450_s21 + $0x50] sm:$0xff] %v1046_v12   ;;  %v541_v21 = vadd.f32 %v1437_v20, %v540_v18  ;;  %v1140_v23 = vpop.f32.mrb[10].mxu1  ;;  %v488_v24 = vadd.f32 %v1124_v22, %v1437_v20  ;;  %v479_v26 = vpop.f32.mrb[11].mxu0  ;;  %v581_v30 = vmax.f32 %v485_v15, 0.0 }
 0x102   : > { %v552_v25 = vadd.f32 %v1140_v23, %v1437_v20  ;;  %v543_v27 = vpop.f32.mrb[11].mxu1  ;;  %v480_v28 = vadd.f32 %v1437_v20, %v479_v26  ;;  %v597_v31 = vmax.f32 %v549_v16, 0.0  ;;  %v579_v34 = vmax.f32 %v477_v19, 0.0 }
 0x103   : > { %v544_v29 = vadd.f32 %v1437_v20, %v543_v27  ;;  %v582_v32 = vmax.f32 %v488_v24, 0.0  ;;  %v595_v35 = vmax.f32 %v541_v21, 0.0 }
 0x104   : > { %v598_v33 = vmax.f32 %v552_v25, 0.0  ;;  %v580_v36 = vmax.f32 %v480_v28, 0.0 }
 0x105   : > { %v596_v37 = vmax.f32 %v544_v29, 0.0  ;;  %v1021_v38 = vpack.c.bf16 %v582_v32, %v581_v30 }
 0x106   : > { %v1061_v39 = vpack.c.bf16 %v598_v33, %v597_v31  ;;  %v1016_v40 = vpack.c.bf16 %v580_v36, %v579_v34  ;;  %v1127_v42 = vpop.f32.mrb[12].mxu0 }
 0x107   : > { %v1056_v41 = vpack.c.bf16 %v596_v37, %v595_v35  ;;  %v1143_v43 = vpop.f32.mrb[12].mxu1  ;;  %1077 = vst [vmem:[%s1450_s21 + $0x28] sm:$0xff] %v1021_v38   ;;  %v501_v44 = vadd.f32 %v1127_v42, %v1437_v20  ;;  %v492_v46 = vpop.f32.mrb[13].mxu0 }
 0x108   : > { %1085 = vst [vmem:[%s1450_s21 + $0x68] sm:$0xff] %v1061_v39   ;;  %v565_v45 = vadd.f32 %v1143_v43, %v1437_v20  ;;  %v556_v47 = vpop.f32.mrb[13].mxu1  ;;  %1076 = vst [vmem:[%s1450_s21 + $0x20] sm:$0xff] %v1016_v40   ;;  %v493_v48 = vadd.f32 %v1437_v20, %v492_v46  ;;  %v1128_v50 = vpop.f32.mrb[14].mxu0 }
 0x109   : > { %1084 = vst [vmem:[%s1450_s21 + $0x60] sm:$0xff] %v1056_v41   ;;  %v557_v49 = vadd.f32 %v1437_v20, %v556_v47  ;;  %v1144_v51 = vpop.f32.mrb[14].mxu1  ;;  %v504_v52 = vadd.f32 %v1128_v50, %v1437_v20  ;;  %v495_v54 = vpop.f32.mrb[15].mxu0  ;;  %v585_v58 = vmax.f32 %v501_v44, 0.0 }
 0x10a   : > { %v568_v53 = vadd.f32 %v1144_v51, %v1437_v20  ;;  %v559_v55 = vpop.f32.mrb[15].mxu1  ;;  %v496_v56 = vadd.f32 %v1437_v20, %v495_v54  ;;  %v601_v59 = vmax.f32 %v565_v45, 0.0  ;;  %v583_v62 = vmax.f32 %v493_v48, 0.0 }
 0x10b   : > { %v560_v57 = vadd.f32 %v1437_v20, %v559_v55  ;;  %v586_v60 = vmax.f32 %v504_v52, 0.0  ;;  %v599_v63 = vmax.f32 %v557_v49, 0.0 }
 0x10c   : > { %v602_v61 = vmax.f32 %v568_v53, 0.0  ;;  %v584_v0 = vmax.f32 %v496_v56, 0.0 }
 0x10d   : > { %v600_v1 = vmax.f32 %v560_v57, 0.0  ;;  %v1031_v2 = vpack.c.bf16 %v586_v60, %v585_v58 }
 0x10e   : > { %v1071_v3 = vpack.c.bf16 %v602_v61, %v601_v59  ;;  %v1026_v20 = vpack.c.bf16 %v584_v0, %v583_v62 }
 0x10f   : > { %v1066_v4 = vpack.c.bf16 %v600_v1, %v599_v63  ;;  %1079 = vst [vmem:[%s1450_s21 + $0x38] sm:$0xff] %v1031_v2  }
 0x110   : > { %1087 = vst [vmem:[%s1450_s21 + $0x78] sm:$0xff] %v1071_v3   ;;  %1078 = vst [vmem:[%s1450_s21 + $0x30] sm:$0xff] %v1026_v20  }
 0x111   : > { %1086 = vst [vmem:[%s1450_s21 + $0x70] sm:$0xff] %v1066_v4  }
 0x112   : > { %1242 = shalt.err (!%p1239_p5)
}
 0x113   : > { %s1243_s7 = scalar_lea.hbm %s1493_s15, 2048  ;;  %s1247_s10 = scalar_lea.hbm %s1552_s3, 4096 }
 0x114   : > { %p1244_p6 = scmp.ne.s32.totalorder %s1493_s15, %s1243_s7  ;;  %p1248_p10 = scmp.lt.u32.totalorder %s1493_s15, %s1552_s3 }
 0x115   : > { %p1249_p11 = scmp.lt.u32.totalorder %s1247_s10, %s1243_s7  ;;  %p1251_p13 = scmp.lt.u32.totalorder %s1243_s7, %s1493_s15 }
 0x116   : > { %p1245_p7 = pnand %p1244_p6, %p1372_p4 }
 0x117   : > { %p1250_p12 = por %p1249_p11, %p1248_p10 }
 0x118   : > { %p1246_p9 = pneg %p1245_p7 }
 0x119   : > { %p1252_p0 = por %p1251_p13, %p1250_p12 }
 0x11b   : > { %p1253_p1 = pnand %p1252_p0, %p1246_p9 }
 0x11d   : > { %1256 = shalt.err (!%p1253_p1)
}
 0x11e   : > { %s1310_s19 = smov 64   ;;  %s1311_s21 = smov 4  }
 0x11f   : > { %1153 = dma.vmem_to_hbm [thread:$0]  (%p1372_p4), %s1495_s26, 2048, %s1493_s15, %s1503_s29, %s1310_s19, %s1310_s19, %s1311_s21  }
 0x120 PF: > { %p1159_p2 = scmp.ge.s32.totalorder %s1307_s17, 2  ;;  %s793_s23 = sand.u32 1, %s1287_s12  }
 0x121   : > { %s794_s27 = scalar_lea.sflag [#allocation3], %s793_s23 }
 0x122   : > { %p1156_p3 = pnand %p1159_p2, %p1379_p8 }
 0x124   : > { %1282 = dma.done.wait (!%p1156_p3), %s794_s27, 2048  }
 0x125   : > { %1284 = vsyncadd (!%p1156_p3), %s794_s27, 4294965248  ;;  %s16_s17 = sadd.s32 1, %s1307_s17   ;;  %s1555_s12 = smov %s1291_s13 }
 0x126   : > { %p13_p5 = scmp.ge.s32.totalorder %s16_s17, 4   ;;  %s1556_s13 = smov %s1295_s14 }
 0x127   : > { %s1557_s14 = smov %s1385_s25  ;;  %s1558_s15 = smov %s1303_s16 }
 0x128   : > { %s1559_s16 = smov %s1561_s20  ;;  %15 = sbr.rel (!%p13_p5) target bundleno = 4 (0x4), region = 73 }
 0x12f   :  { %799 = vsyncpa [#allocation3], 1 }
 0x130   :  { %801 = vsyncpa [#allocation3 + $0x1], 1 }

</bundles_post_ra>
